<compile_context>
chip_gen: v7x
topology: tpu7x:2x2x1
jax: 0.10.0
libtpu: 0.0.40
codegen_flags: <defaults>
</compile_context>

<pallas_src>
import functools

import numpy as np
import jax
import jax.numpy as jnp
from jax.experimental import pallas as pl
from jax.experimental.pallas import tpu as pltpu


def _round_up(x, m):
    return (x + m - 1) // m * m


def _vmem_capacity_bytes():
    """Generation-aware VMEM capacity (v5e/v6e: 128 MiB, v7x: 64 MiB)."""
    try:
        cap = getattr(pltpu.get_tpu_info(), "vmem_capacity_bytes", None)
        if cap:
            return int(cap)
    except Exception:
        pass
    return 64 * 2**20  # conservative (v7x-sized) fallback


def _deconv_mm_kernel(x_ref, w_ref, b_ref, o_ref, *, act):
    # x_ref: (TR, Kin)  rows = groups of G input pixels, lanes = G*Cin features
    # w_ref: (Kin, L)   block-diagonal weight, L = G*taps*Cout (lane-dense)
    # b_ref: (1, L)     per-(pixel, tap)-replicated bias (zeros on general path)
    # o_ref: (TR, L)
    acc = jnp.dot(x_ref[...], w_ref[...], preferred_element_type=jnp.float32)
    acc = acc + b_ref[...]
    if act:
        acc = jnp.maximum(acc, 0.0)
    o_ref[...] = acc.astype(o_ref.dtype)


def deconv_forward(x_nchw, weight, bias, *, stride=2, padding=0,
                   output_padding=0, act=False, tile_m=4096,
                   compute_dtype=jnp.float32):
    """PyTorch nn.ConvTranspose2d semantics (+ optional ReLU).

    x_nchw: (N, Cin, H, W); weight: (Cin, Cout, kH, kW); bias: (Cout,) or None.
    Returns (N, Cout, Ho, Wo), Ho = (H-1)*stride - 2*padding + kH + output_padding.
    """
    N, Cin, H, W = x_nchw.shape
    w_cin, Cout, kH, kW = weight.shape
    assert w_cin == Cin
    s, p, op = stride, padding, output_padding
    Ho = (H - 1) * s - 2 * p + kH + op
    Wo = (W - 1) * s - 2 * p + kW + op
    taps = kH * kW
    TC = taps * Cout
    out_dtype = x_nchw.dtype
    if bias is None:
        bias = jnp.zeros((Cout,), jnp.float32)

    # stride == kernel_size, no output_padding: taps never overlap -> pure
    # depth-to-space interleave; bias/ReLU fuse into the kernel epilogue.
    fast = (s == kH == kW) and (op == 0)

    # Lane folding: fold G consecutive pixels into one matmul row so the output
    # row width L = G*TC is an exact multiple of 128 (dense, unpadded vst).
    # Falls back to G=1 (unpadded, masked stores) if no small G works.
    G = 1
    while (G * TC) % 128 != 0 and G < 8:
        G *= 2
    if (G * TC) % 128 != 0:
        G = 1
    Kin = G * Cin
    L = G * TC

    M = N * H * W
    cs = jnp.dtype(compute_dtype).itemsize
    store_dtype = out_dtype if fast else jnp.float32
    osize = jnp.dtype(store_dtype).itemsize

    # ---- matmul operands (layout plumbing only, no data amplification) ----
    x_rows = jnp.transpose(x_nchw, (0, 2, 3, 1)).reshape(M, Cin)  # (n,h,w) x ci
    # w2[ci, (kh*kW + kw)*Cout + co] = weight[ci, co, kh, kw]
    w2 = jnp.transpose(weight, (0, 2, 3, 1)).reshape(Cin, TC)
    wg = jnp.kron(jnp.eye(G, dtype=w2.dtype), w2) if G > 1 else w2
    wg = wg.astype(compute_dtype)

    if fast:
        b_row = jnp.tile(bias.astype(jnp.float32), (G * taps,)).reshape(1, L)
    else:
        b_row = jnp.zeros((1, L), jnp.float32)  # bias added after tap scatter

    # ---- row tiling: large tiles, VMEM-budgeted, >=2 steps for v7x megacore ----
    row_align = 16                                # safe for f32 and bf16 tiles
    Mr = pl.cdiv(M, G)                            # folded rows of real pixels
    tr = max(row_align, _round_up(max(tile_m, 1) // G, row_align))
    # Guarantee >= 2 grid steps whenever possible: v7x has 2 TensorCores
    # sharing the "parallel" axis; extra cost on v5e/v6e is one step overhead.
    tr = min(tr, max(row_align, _round_up(pl.cdiv(Mr, 2), row_align)))

    vmem_cap = _vmem_capacity_bytes()
    budget = int(0.40 * vmem_cap)

    def _vmem_bytes(t):   # double-buffered in/out tiles + weights + bias
        return 2 * (t * Kin * cs + t * L * osize) + 2 * (Kin * L * cs + L * 4)

    while tr > row_align and _vmem_bytes(tr) > budget:
        tr = max(row_align, _round_up(tr // 2, row_align))

    num_tiles = pl.cdiv(Mr, tr)
    Mr_pad = num_tiles * tr

    x_rows = jnp.pad(x_rows, ((0, Mr_pad * G - M), (0, 0))).astype(compute_dtype)
    x_f = x_rows.reshape(Mr_pad, Kin)

    vmem_limit = int(min(max(16 * 2**20, 2 * _vmem_bytes(tr)),
                         int(0.45 * vmem_cap)))
    cost = pl.CostEstimate(
        flops=2 * M * Cin * TC,
        transcendentals=0,
        bytes_accessed=M * Cin * cs + Cin * TC * cs + Cout * 4 + M * TC * osize)

    yt = pl.pallas_call(
        functools.partial(_deconv_mm_kernel, act=(act and fast)),
        out_shape=jax.ShapeDtypeStruct((Mr_pad, L), store_dtype),
        grid=(num_tiles,),
        in_specs=[
            pl.BlockSpec((tr, Kin), lambda i: (i, 0)),
            pl.BlockSpec((Kin, L), lambda i: (0, 0)),
            pl.BlockSpec((1, L), lambda i: (0, 0)),
        ],
        out_specs=pl.BlockSpec((tr, L), lambda i: (i, 0)),
        compiler_params=pltpu.CompilerParams(
            dimension_semantics=("parallel",),
            vmem_limit_bytes=vmem_limit),
        cost_estimate=cost,
    )(x_f, wg, b_row)

    # Unfold the G pixels/row (free reshape, same element order), drop padding.
    yt = yt.reshape(-1, TC)[:M].reshape(N, H, W, kH, kW, Cout)

    if fast:
        # depth-to-space interleave + NCHW layout in a single XLA transpose pass
        out = jnp.transpose(yt, (0, 5, 1, 3, 2, 4)).reshape(N, Cout, H * kH, W * kW)
        if p:
            out = out[:, :, p:p + Ho, p:p + Wo]
        return out.astype(out_dtype)

    # General stride/padding/output_padding: static strided scatter-add of taps.
    # TODO(synk): overlapping-tap accumulation stays in XLA slice-adds; an
    # output-stationary Pallas kernel would cut the ~2*kH*kW canvas passes.
    Hc = (H - 1) * s + kH + op
    Wc = (W - 1) * s + kW + op
    canvas = jnp.zeros((N, Hc, Wc, Cout), jnp.float32)
    for kh in range(kH):
        for kw in range(kW):
            canvas = canvas.at[:, kh:kh + (H - 1) * s + 1:s,
                               kw:kw + (W - 1) * s + 1:s, :].add(
                                   yt[:, :, :, kh, kw, :])
    out = canvas[:, p:p + Ho, p:p + Wo, :] + bias.astype(jnp.float32)
    if act:
        out = jnp.maximum(out, 0.0)
    return jnp.transpose(out, (0, 3, 1, 2)).astype(out_dtype)


def _ref_deconv_np(x, w, b, stride, padding, output_padding, act):
    """Direct numpy implementation of PyTorch ConvTranspose2d semantics."""
    x = np.asarray(x, np.float32)
    w = np.asarray(w, np.float32)
    b = np.asarray(b, np.float32)
    N, Cin, H, W = x.shape
    _, Cout, kH, kW = w.shape
    Ho = (H - 1) * stride - 2 * padding + kH + output_padding
    Wo = (W - 1) * stride - 2 * padding + kW + output_padding
    y = np.zeros((N, Cout, Ho, Wo), np.float32)
    for ih in range(H):
        for iw in range(W):
            for kh in range(kH):
                for kw in range(kW):
                    oh = ih * stride - padding + kh
                    ow = iw * stride - padding + kw
                    if 0 <= oh < Ho and 0 <= ow < Wo:
                        y[:, :, oh, ow] += x[:, :, ih, iw] @ w[:, :, kh, kw]
    y += b[None, :, None, None]
    if act:
        y = np.maximum(y, 0.0)
    return y


if __name__ == "__main__":
    key = jax.random.PRNGKey(0)
    k0, k1, k2, k3, k4 = jax.random.split(key, 5)

    # Deconv(input_channels=4, n_feats=8, kernel_size=2, stride=2, act=True)
    N, Cin, H, W = 2, 4, 16, 16
    Cout = 8
    x = jax.random.normal(k0, (N, Cin, H, W), jnp.float32)

    ok = True

    # --- fast path: stride == kernel_size (module's default usage) ---
    kH = kW = 2
    bound = 1.0 / np.sqrt(Cout * kH * kW)
    w_a = jax.random.uniform(k1, (Cin, Cout, kH, kW), jnp.float32,
                             minval=-bound, maxval=bound)
    b_a = jax.random.uniform(k2, (Cout,), jnp.float32,
                             minval=-bound, maxval=bound)
    for act in (True, False):
        out = jax.block_until_ready(deconv_forward(
            x, w_a, b_a, stride=2, padding=0, output_padding=0, act=act))
        ref = _ref_deconv_np(x, w_a, b_a, 2, 0, 0, act)
        ok &= out.shape == ref.shape
        ok &= np.allclose(np.asarray(out), ref, rtol=1e-4, atol=1e-4)

    # --- bf16-fed MXU variant (f32 accumulation), looser tolerance ---
    out = jax.block_until_ready(deconv_forward(
        x, w_a, b_a, stride=2, padding=0, output_padding=0, act=True,
        compute_dtype=jnp.bfloat16))
    ref = _ref_deconv_np(x, w_a, b_a, 2, 0, 0, True)
    ok &= out.shape == ref.shape
    ok &= np.allclose(np.asarray(out), ref, rtol=2e-2, atol=2e-2)

    # --- general path: overlapping taps (k=3, s=2, p=1, output_padding=1) ---
    kH = kW = 3
    bound = 1.0 / np.sqrt(Cout * kH * kW)
    w_b = jax.random.uniform(k3, (Cin, Cout, kH, kW), jnp.float32,
                             minval=-bound, maxval=bound)
    b_b = jax.random.uniform(k4, (Cout,), jnp.float32,
                             minval=-bound, maxval=bound)
    out = jax.block_until_ready(deconv_forward(
        x, w_b, b_b, stride=2, padding=1, output_padding=1, act=True))
    ref = _ref_deconv_np(x, w_b, b_b, 2, 1, 1, True)
    ok &= out.shape == ref.shape
    ok &= np.allclose(np.asarray(out), ref, rtol=1e-4, atol=1e-4)

    print("KERNEL_OK" if ok else "MISMATCH")
</pallas_src>

<mosaic_0001>
module attributes {stable_mosaic.version = 11 : i64} {
  func.func @_deconv_mm_kernel(%arg0: i32, %arg1: memref<64x16xf32, #tpu.memory_space<vmem>>, %arg2: memref<16x128xf32, #tpu.memory_space<vmem>>, %arg3: memref<1x128xf32, #tpu.memory_space<vmem>>, %arg4: memref<64x128xf32, #tpu.memory_space<vmem>>) attributes {dimension_semantics = [#tpu.dimension_semantics<parallel>], iteration_bounds = array<i64: 2>, scalar_prefetch = 0 : i64, scratch_operands = 0 : i64, tpu.core_type = #tpu.core_type<tc>, window_params = [{transform_indices = @transform_0, window_bounds = array<i64: 64, 16>}, {pipeline_mode = #tpu.pipeline_mode<synchronous>, transform_indices = @transform_1, window_bounds = array<i64: 16, 128>}, {pipeline_mode = #tpu.pipeline_mode<synchronous>, transform_indices = @transform_2, window_bounds = array<i64: 1, 128>}, {transform_indices = @transform_3, window_bounds = array<i64: 64, 128>}]} {
    %c0 = arith.constant 0 : index
    %c0_0 = arith.constant 0 : index
    %0 = vector.load %arg1[%c0, %c0_0] : memref<64x16xf32, #tpu.memory_space<vmem>>, vector<64x16xf32>
    %c0_1 = arith.constant 0 : index
    %c0_2 = arith.constant 0 : index
    %1 = vector.load %arg2[%c0_1, %c0_2] : memref<16x128xf32, #tpu.memory_space<vmem>>, vector<16x128xf32>
    %cst = arith.constant dense<0.000000e+00> : vector<64x128xf32>
    %2 = tpu.matmul %0, %1, %cst {dimension_numbers = #tpu.dot_dimension_numbers<[1], [0], [0], [1], [0, 0, 1, 1], [], []>} : vector<64x16xf32>, vector<16x128xf32>, vector<64x128xf32> -> vector<64x128xf32>
    %c0_3 = arith.constant 0 : index
    %c0_4 = arith.constant 0 : index
    %3 = vector.load %arg3[%c0_3, %c0_4] : memref<1x128xf32, #tpu.memory_space<vmem>>, vector<1x128xf32>
    %4 = vector.broadcast %3 : vector<1x128xf32> to vector<64x128xf32>
    %5 = arith.addf %2, %4 : vector<64x128xf32>
    %cst_5 = arith.constant 0.000000e+00 : f32
    %6 = vector.broadcast %cst_5 : f32 to vector<64x128xf32>
    %7 = arith.maximumf %5, %6 : vector<64x128xf32>
    %c0_6 = arith.constant 0 : index
    %c0_7 = arith.constant 0 : index
    %8 = vector.load %arg4[%c0_6, %c0_7] : memref<64x128xf32, #tpu.memory_space<vmem>>, vector<64x128xf32>
    tpu.vector_store %arg4[%c0_6, %c0_7], %7 {strides = array<i32>} : memref<64x128xf32, #tpu.memory_space<vmem>>, vector<64x128xf32>,
    return
  }
  func.func @transform_0(%arg0: i32) -> (i32, i32) {
    %c0_i32 = arith.constant 0 : i32
    %c0_i32_0 = arith.constant 0 : i32
    return %arg0, %c0_i32 : i32, i32
  }
  func.func @transform_1(%arg0: i32) -> (i32, i32) {
    %c0_i32 = arith.constant 0 : i32
    %c0_i32_0 = arith.constant 0 : i32
    %c0_i32_1 = arith.constant 0 : i32
    return %c0_i32, %c0_i32_0 : i32, i32
  }
  func.func @transform_2(%arg0: i32) -> (i32, i32) {
    %c0_i32 = arith.constant 0 : i32
    %c0_i32_0 = arith.constant 0 : i32
    %c0_i32_1 = arith.constant 0 : i32
    return %c0_i32, %c0_i32_0 : i32, i32
  }
  func.func @transform_3(%arg0: i32) -> (i32, i32) {
    %c0_i32 = arith.constant 0 : i32
    %c0_i32_0 = arith.constant 0 : i32
    return %arg0, %c0_i32 : i32, i32
  }
}

</mosaic_0001>

<bundles_post_ra>
// kernel: tpu_custom_call.1
= control target key start
LH: loop header
LB: loop body
LE: loop exit
PB: predicated region body
PF: predicated region fallthrough
CT: control target
= control target key end

     0   :  { %8 = vsyncpa [#allocation3], 0  ;;  %s716_s0 = inlined_call_operand.vmem [shape: f32[128,16], index: 0, kind: input, shape index: {}]   ;;  %s717_s1 = inlined_call_operand.vmem [shape: f32[16,128], index: 1, kind: input, shape index: {}]   ;;  %s718_s2 = inlined_call_operand.vmem [shape: f32[1,128], index: 2, kind: input, shape index: {}]   ;;  %s719_s3 = inlined_call_operand.hbm [shape: f32[128,128], index: 3, kind: output, shape index: {}]  }
   0x1   :  { %10 = vsyncpa [#allocation3 + $0x1], 0  ;;  %s593_s12 = smov 0   ;;  %s595_s13 = smov 0  }
   0x2   :  { %s597_s14 = smov 0   ;;  %s599_s15 = smov 0  }
   0x3 LB: > { %s614_s16 = sadd.s32 4294967295, %s568_s15   ;;  %s411_s17 = sadd.s32 4294967294, %s568_s15   ;;  %s568_s15 = sphi %s599_s15, %s725_s15   ;;  %s564_s14 = sphi %s597_s14, %s724_s14   ;;  %s560_s13 = sphi %s595_s13, %s723_s13   ;;  %s556_s12 = sphi %s593_s12, %s722_s12  }
   0x4   : > { %s618_s18 = sadd.s32 1, %s568_s15   ;;  %s91_s19 = sadd.s32 1, %s564_s14 }
   0x5   : > { %s88_s20 = ssub.s32 %s568_s15, %s618_s18  ;;  %p101_p0 = scmp.ne.s32.totalorder %s564_s14, %s560_s13 }
   0x6   : > { %p89_p1 = scmp.eq.s32.totalorder %s88_s20, 0  ;;  %p102_p2 = scmp.eq.s32.totalorder %s614_s16, 1 }
   0x7   : > { %p107_p3 = scmp.ne.s32.totalorder %s560_s13, %s556_s12  ;;  %p108_p4 = scmp.eq.s32.totalorder %s411_s17, 1 }
   0x8   : > { %s629_s21 = scalar_select %p89_p1, %s564_s14, %s91_s19  }
   0x9   : > { %p631_p5 = por %p102_p2, %p101_p0  ;;  %p635_p6 = por %p108_p4, %p107_p3 }
   0xa   : > { %p414_p7 = scmp.ge.s32.totalorder %s568_s15, 1  ;;  %p141_p8 = scmp.lt.s32.totalorder %s568_s15, 3 }
   0xc   : > { %p142_p9 = pnand %p414_p7, %p141_p8 }
   0xd   : > { %v180_v0 = vld [vmem:[%s717_s1] sm:$0xff] (!%p142_p9)  ;;  %v181_v1 = vld [vmem:[%s717_s1 + $0x8] sm:$0xff] (!%p142_p9)  ;;  %s416_s28 = sshll.u32 (!%p142_p9), %s614_s16, 3  ;;  %vm189_vm0 = vcmask (!%p142_p9), 130048   ;;  %s162_s6 = sand.u32 (!%p142_p9), 1, %s560_s13  }
   0xe   : > { %145 = sbr.rel (%p142_p9) target bundleno = 263 (0x107), region = 32  ;;  %v459_v2 = vpack.c.bf16 (!%p142_p9), %v181_v1, %v180_v0  ;;  %p166_p10 = scmp.lt.s32.totalorder (!%p142_p9), %s416_s28, 15  ;;  %v418_v11 = vld [vmem:[%s718_s2] ss:$0 sm:$0xff] (!%p142_p9) }
   0xf   : > { %s415_s9 = sshll.u32 (!%p142_p9), %s162_s6, 6  ;;  %s432_s10 = sshll.u32 (!%p142_p9), %s614_s16, 10 }
  0x10   : > { %460 = vmatprep.subr.bf16.mxu0 (!%p142_p9), %v459_v2  ;;  %463 = vmatprep.subr.bf16.mxu1 (!%p142_p9), %v459_v2  ;;  %s164_s11 = scalar_lea.vmem (!%p142_p9), [#allocation2], %s415_s9  ;;  %s669_s16 = scalar_lea.hbm (!%p142_p9), %s719_s3, %s432_s10 }
  0x11   : > { %462 = vmatpush3.bf16.msra.mxu0 (!%p142_p9), %v459_v2  ;;  %464 = vmatpush3.bf16.msra.mxu1 (!%p142_p9), %v459_v2  ;;  %s349_s17 = sshll.u32 (!%p142_p9), %s164_s11, 4  ;;  %s675_s24 = scalar_lea.sflag (!%p142_p9), [#allocation3], %s162_s6  ;;  %s671_s17 = int_to_ptr.vmem [resolvable:$true] %s349_s17 }
  0x12   : > { %s506_s25 = scalar_lea.vmem (!%p142_p9), %s671_s17, 1024  ;;  %s570_s26 = smov (!%p142_p9), [#allocation2]  }
  0x13   : > { %p507_p11 = scmp.ne.s32.totalorder (!%p142_p9), %s671_s17, %s506_s25  ;;  %s510_s27 = sshll.u32 (!%p142_p9), %s570_s26, 4  ;;  %s511_s27 = int_to_ptr.vmem [resolvable:$false] %s510_s27 }
  0x14   : > { %p513_p0 = scmp.lt.s32.totalorder (!%p142_p9), %s671_s17, %s511_s27 }
  0x15   : > { %s727_s28 = smov (!%p166_p10, %s416_s28), 15  ;;  %p508_p12 = pnand %p507_p11, %p631_p5 }
  0x16   : > { %s417_s29 = sshll.u32 %s727_s28, 3  ;;  %s512_s28 = scalar_lea.vmem %s511_s27, 2048 }
  0x17   : > { %s169_s5 = scalar_lea.vmem %s716_s0, %s417_s29  ;;  %p509_p13 = pneg %p508_p12 }
  0x18   : > { %v172_v3 = vld [vmem:[%s169_s5] sm:$0xff]  ;;  %v173_v5 = vld [vmem:[%s169_s5 + $0x8] sm:$0xff]  ;;  %v174_v7 = vld [vmem:[%s169_s5 + $0x10] sm:$0xff]  ;;  %p514_p1 = scmp.lt.s32.totalorder %s512_s28, %s506_s25 }
  0x19   : > { %v176_v4 = vld [vmem:[%s169_s5 + $0x20] sm:$0xff]  ;;  %447 = vmatprep.mubr.msk.f32.mxu0 %vm189_vm0, %v172_v3  ;;  %v177_v6 = vld [vmem:[%s169_s5 + $0x28] sm:$0xff]  ;;  %v178_v8 = vld [vmem:[%s169_s5 + $0x30] sm:$0xff] }
  0x1a   : > { %453 = vmatprep.mubr.msk.f32.mxu1 %vm189_vm0, %v176_v4  ;;  %448 = vmatmul.mubr.msk.f32.vlgmr.msra.gmra.mrb[0].mxu0 %vm189_vm0, %v173_v5  ;;  %v175_v9 = vld [vmem:[%s169_s5 + $0x18] sm:$0xff]  ;;  %p515_p2 = por %p514_p1, %p513_p0 }
  0x1b   : > { %454 = vmatmul.mubr.msk.f32.vlgmr.msra.gmra.mrb[0].mxu1 %vm189_vm0, %v177_v6  ;;  %450 = vmatprep.mubr.msk.f32.mxu0 %vm189_vm0, %v174_v7  ;;  %v179_v10 = vld [vmem:[%s169_s5 + $0x38] sm:$0xff] }
  0x1c   : > { %456 = vmatprep.mubr.msk.f32.mxu1 %vm189_vm0, %v178_v8  ;;  %p516_p3 = pnand %p515_p2, %p509_p13 }
  0x1e   : > { %451 = vmatmul.mubr.msk.f32.gmra.mrb[2].mxu0 %vm189_vm0, %v175_v9 }
  0x1f   : > { %457 = vmatmul.mubr.msk.f32.gmra.mrb[2].mxu1 %vm189_vm0, %v179_v10 }
  0xed   : > { %v449_v12 = vpop.f32.mrb[0].mxu0 }
  0xee   : > { %v455_v13 = vpop.f32.mrb[0].mxu1  ;;  %v286_v14 = vadd.f32 %v449_v12, %v418_v11  ;;  %v280_v16 = vpop.f32.mrb[1].mxu0 }
  0xef   : > { %v306_v15 = vadd.f32 %v455_v13, %v418_v11  ;;  %v300_v17 = vpop.f32.mrb[1].mxu1  ;;  %v281_v18 = vadd.f32 %v418_v11, %v280_v16 }
  0xf0   : > { %v301_v19 = vadd.f32 %v418_v11, %v300_v17  ;;  %v320_v20 = vmax.f32 %v286_v14, 0.0 }
  0xf1   : > { %v324_v21 = vmax.f32 %v306_v15, 0.0  ;;  %v319_v22 = vmax.f32 %v281_v18, 0.0  ;;  %v452_v24 = vpop.f32.mrb[2].mxu0 }
  0xf2   : > { %v323_v23 = vmax.f32 %v301_v19, 0.0  ;;  %v458_v25 = vpop.f32.mrb[2].mxu1  ;;  %328 = vst [vmem:[%s164_s11 + $0x8] sm:$0xff] %v320_v20  ;;  %v296_v26 = vadd.f32 %v452_v24, %v418_v11  ;;  %v290_v28 = vpop.f32.mrb[3].mxu0 }
  0xf3   : > { %332 = vst [vmem:[%s164_s11 + $0x28] sm:$0xff] %v324_v21  ;;  %v316_v27 = vadd.f32 %v458_v25, %v418_v11  ;;  %v310_v29 = vpop.f32.mrb[3].mxu1  ;;  %327 = vst [vmem:[%s164_s11] sm:$0xff] %v319_v22  ;;  %v291_v30 = vadd.f32 %v418_v11, %v290_v28 }
  0xf4   : > { %331 = vst [vmem:[%s164_s11 + $0x20] sm:$0xff] %v323_v23  ;;  %v311_v31 = vadd.f32 %v418_v11, %v310_v29  ;;  %v322_v32 = vmax.f32 %v296_v26, 0.0 }
  0xf5   : > { %v326_v33 = vmax.f32 %v316_v27, 0.0  ;;  %v321_v34 = vmax.f32 %v291_v30, 0.0 }
  0xf6   : > { %v325_v35 = vmax.f32 %v311_v31, 0.0  ;;  %330 = vst [vmem:[%s164_s11 + $0x18] sm:$0xff] %v322_v32 }
  0xf7   : > { %334 = vst [vmem:[%s164_s11 + $0x38] sm:$0xff] %v326_v33  ;;  %329 = vst [vmem:[%s164_s11 + $0x10] sm:$0xff] %v321_v34 }
  0xf8   : > { %333 = vst [vmem:[%s164_s11 + $0x30] sm:$0xff] %v325_v35 }
  0xf9   : > { %519 = shalt.err (!%p516_p3)
}
  0xfa   : > { %s520_s29 = scalar_lea.hbm %s669_s16, 1024  ;;  %s524_s5 = scalar_lea.hbm %s719_s3, 2048 }
  0xfb   : > { %p521_p4 = scmp.ne.s32.totalorder %s669_s16, %s520_s29  ;;  %p525_p9 = scmp.lt.u32.totalorder %s669_s16, %s719_s3 }
  0xfc   : > { %p526_p10 = scmp.lt.u32.totalorder %s524_s5, %s520_s29  ;;  %p528_p12 = scmp.lt.u32.totalorder %s520_s29, %s669_s16 }
  0xfd   : > { %p522_p7 = pnand %p521_p4, %p631_p5 }
  0xfe   : > { %p527_p11 = por %p526_p10, %p525_p9 }
  0xff   : > { %p523_p8 = pneg %p522_p7 }
 0x100   : > { %p529_p13 = por %p528_p12, %p527_p11 }
 0x102   : > { %p530_p0 = pnand %p529_p13, %p523_p8 }
 0x104   : > { %533 = shalt.err (!%p530_p0)
}
 0x105   : > { %s571_s8 = smov 128   ;;  %s572_s9 = smov 8  }
 0x106   : > { %465 = dma.vmem_to_hbm [thread:$0]  (%p631_p5), %s671_s17, 1024, %s669_s16, %s675_s24, %s571_s8, %s571_s8, %s572_s9  }
 0x107 PF: > { %p471_p1 = scmp.ge.s32.totalorder %s568_s15, 2  ;;  %s364_s10 = sand.u32 1, %s556_s12  }
 0x108   : > { %s365_s11 = scalar_lea.sflag [#allocation3], %s364_s10 }
 0x109   : > { %p468_p2 = pnand %p471_p1, %p635_p6 }
 0x10b   : > { %551 = dma.done.wait (!%p468_p2), %s365_s11, 1024  }
 0x10c   : > { %553 = vsyncadd (!%p468_p2), %s365_s11, 4294966272  ;;  %p13_p3 = scmp.ge.s32.totalorder %s618_s18, 4   ;;  %s722_s12 = smov %s560_s13 }
 0x10d   : > { %s723_s13 = smov %s564_s14  ;;  %s724_s14 = smov %s629_s21 }
 0x10e   : > { %s725_s15 = smov %s618_s18  ;;  %15 = sbr.rel (!%p13_p3) target bundleno = 3 (0x3), region = 67 }
 0x115   :  { %370 = vsyncpa [#allocation3], 1 }
 0x116   :  { %372 = vsyncpa [#allocation3 + $0x1], 1 }

</bundles_post_ra>
